<compile_context>
chip_gen: v5e
topology: v5e:2x2
jax: 0.10.0
libtpu: 0.0.40
codegen_flags: <defaults>
</compile_context>

<pallas_src>
import functools
import math

import jax
import jax.numpy as jnp
from jax.experimental import pallas as pl
from jax.experimental.pallas import tpu as pltpu

_BN_EPS = 1e-5
_LANE = 128
_WOFF = 8                        # sublane-aligned interior offset (W) in the dw scratch
_ROW_TILE_HARD_CAP = 4096        # ~0.35us/step grid overhead is amortized by here


def _round_up(x, m):
    return ((x + m - 1) // m) * m


def _vmem_limit_bytes():
    """Generation-aware VMEM budget: ~0.75x physical (96 MiB on v5e/v6e's
    128 MiB, 48 MiB on v7x's 64 MiB); conservative 48 MiB if the query fails."""
    phys = 64 * 1024 * 1024
    try:
        phys = int(pltpu.get_tpu_info().vmem_capacity_bytes)
    except Exception:
        pass
    return int(min(max(phys * 3 // 4, 32 * 1024 * 1024), 112 * 1024 * 1024))


def _row_cap(per_row_bytes, vmem_limit, fixed_bytes=0):
    """Largest row tile such that the (double-buffered) working set stays well
    inside the VMEM budget, clamped to the grid-overhead sweet spot."""
    avail = int(0.6 * vmem_limit) - fixed_bytes
    return max(8, min(_ROW_TILE_HARD_CAP, avail // max(per_row_bytes, 1)))


def _pick_tile(m, cap):
    """Largest legal row tile (multiple of 8 dividing m) that is <= cap.
    If m is not a multiple of 8 the only legal block is the full dim (rare)."""
    cap = max(8, min(cap, m))
    if m % 8 != 0:
        return m                       # full-dim block is always legal
    t = (cap // 8) * 8
    while t >= 8:
        if m % t == 0:
            return t
        t -= 8
    return m


def _largest_divisor_leq(n, cap):
    cap = max(1, min(cap, n))
    for t in range(cap, 0, -1):
        if n % t == 0:
            return t
    return 1


def _cparams(vmem_limit, *sem):
    return pltpu.CompilerParams(dimension_semantics=sem,
                                vmem_limit_bytes=vmem_limit)


def _swish(x):
    return x * (1.0 / (1.0 + jnp.exp(-x)))


def _bn_affine(sum_c, sumsq_c, count, gamma_p, beta_p):
    """Fold batch stats into per-channel scale/shift (tiny, plain JAX)."""
    mean = sum_c / count
    var = jnp.maximum(sumsq_c / count - mean * mean, 0.0)      # biased var
    scale = gamma_p * jax.lax.rsqrt(var + _BN_EPS)             # (1, C)
    shift = beta_p - mean * scale                              # (1, C)
    return scale.astype(jnp.float32), shift.astype(jnp.float32)


# ---------------------------------------------------------------------------
# K1: expand 1x1 conv as (tm, Ck) @ (Ck, Hp) matmul + per-tile BN1 sums
# ---------------------------------------------------------------------------
def _expand_kernel(x_ref, w_ref, y_ref, st_ref):
    y = jnp.dot(x_ref[...], w_ref[...], preferred_element_type=jnp.float32)
    y_ref[...] = y.astype(y_ref.dtype)
    s = jnp.sum(y, axis=0, keepdims=True)
    q = jnp.sum(y * y, axis=0, keepdims=True)
    st_ref[0] = jnp.concatenate([s, q], axis=0)


# ---------------------------------------------------------------------------
# K2: BN1-apply + swish + depthwise KxK conv (halo + stride in-kernel, per
#     H-strip) + per-(image,strip) BN2 sums.
#     grid = (n images ["parallel"], output-row strips ["arbitrary"]).
# ---------------------------------------------------------------------------
def _dw_kernel(y1_ref, s1_ref, t1_ref, wdw_ref, y2_ref, st_ref, pad_scr, *,
               ksize, stride, pad, hs, n_strips):
    _, h, w, c = y1_ref.shape
    wo = y2_ref.shape[2]
    s_idx = pl.program_id(1)

    # Strip 0 of every image refreshes the scratch: zero ONLY the halo strips
    # (the interior is fully overwritten below, the scratch persists across
    # grid steps), then write the BN1+swish-activated image at a sublane-
    # aligned interior offset.  This drops the full-scratch re-zero of the
    # previous version (one whole extra f32 store pass per image).
    @pl.when(s_idx == 0)
    def _prep():
        wsz = pad_scr.shape[1]
        pad_scr[0:pad, :, :] = jnp.zeros((pad, wsz, c), jnp.float32)
        pad_scr[pad + h:, :, :] = jnp.zeros((pad, wsz, c), jnp.float32)
        pad_scr[pad:pad + h, 0:_WOFF, :] = jnp.zeros((h, _WOFF, c), jnp.float32)
        pad_scr[pad:pad + h, _WOFF + w:, :] = jnp.zeros((h, pad, c), jnp.float32)
        # activation written in small row chunks to bound live f32 values
        rb = 8
        for r0 in range(0, h, rb):
            r1 = min(h, r0 + rb)
            x = y1_ref[0, r0:r1, :, :].astype(jnp.float32)
            xa = _swish(x * s1_ref[...] + t1_ref[...])    # BN1 + swish (f32 VPU)
            pad_scr[pad + r0:pad + r1, _WOFF:_WOFF + w, :] = xa

    # Depthwise conv for this strip of output rows only (bounds the live f32
    # accumulator; taps -- including stride-2 -- read straight from the halo
    # scratch, so there is no padded HBM tensor and no 4x stride-2 waste).
    # TODO(synk): realize the kw shifts with pltpu.roll (XLU) to offload the
    # unaligned sublane fixups from the vld/VALU slots.
    acc = jnp.zeros((hs, wo, c), jnp.float32)
    for kh in range(ksize):
        if n_strips == 1:
            row0 = kh                                     # static path
        else:
            row0 = s_idx * (hs * stride) + kh
        for kw in range(ksize):
            col0 = _WOFF - pad + kw
            if stride == 1:
                tap = pad_scr[pl.ds(row0, hs), col0:col0 + wo, :]
            else:
                tap = pad_scr[pl.ds(row0, hs, stride=stride),
                              pl.ds(col0, wo, stride=stride), :]
            idx = kh * ksize + kw
            acc = acc + tap * wdw_ref[idx:idx + 1, :]

    y2_ref[0] = acc.astype(y2_ref.dtype)
    ssum = jnp.sum(acc, axis=(0, 1), keepdims=True)[0]
    sq = jnp.sum(acc * acc, axis=(0, 1), keepdims=True)[0]
    st_ref[0] = jnp.concatenate([ssum, sq], axis=0)


# ---------------------------------------------------------------------------
# K3: BN2-apply + swish + SE global average pool (per image)
# ---------------------------------------------------------------------------
def _se_pool_kernel(y2_ref, s2_ref, t2_ref, pool_ref):
    x = y2_ref[0].astype(jnp.float32)
    xa = _swish(x * s2_ref[...] + t2_ref[...])
    pool_ref[0] = jnp.mean(xa, axis=(0, 1), keepdims=True)[0]


# ---------------------------------------------------------------------------
# K4: SE FC -> ReLU -> FC -> sigmoid   (tiny: (N, Hp) x (Hp, Rp) x (Rp, Hp))
# ---------------------------------------------------------------------------
def _se_fc_kernel(p_ref, w1_ref, w2_ref, o_ref):
    h = jnp.maximum(jnp.dot(p_ref[...], w1_ref[...],
                            preferred_element_type=jnp.float32), 0.0)
    s = jnp.dot(h, w2_ref[...], preferred_element_type=jnp.float32)
    o_ref[...] = 1.0 / (1.0 + jnp.exp(-s))


# ---------------------------------------------------------------------------
# K5: BN2-apply + swish + SE scale + project 1x1 matmul + per-tile BN3 sums
# ---------------------------------------------------------------------------
def _project_kernel(y2_ref, s2_ref, t2_ref, se_ref, w_ref, y3_ref, st_ref):
    x = y2_ref[0].astype(jnp.float32)                   # (tm, Hp)
    xa = _swish(x * s2_ref[...] + t2_ref[...]) * se_ref[0]
    y = jnp.dot(xa.astype(jnp.bfloat16), w_ref[...],
                preferred_element_type=jnp.float32)     # (tm, Op)
    y3_ref[0] = y.astype(y3_ref.dtype)
    s = jnp.sum(y, axis=0, keepdims=True)
    q = jnp.sum(y * y, axis=0, keepdims=True)
    st_ref[0] = jnp.concatenate([s, q], axis=0)


# ---------------------------------------------------------------------------
# K6: BN3-apply
# ---------------------------------------------------------------------------
def _bn_out_kernel(y3_ref, s3_ref, t3_ref, o_ref):
    o_ref[...] = y3_ref[...].astype(jnp.float32) * s3_ref[...] + t3_ref[...]


# ---------------------------------------------------------------------------
# Wrapper
# ---------------------------------------------------------------------------
def mbconv_forward(x_nchw, params, *, kernel_size, stride, expand_ratio):
    assert stride in (1, 2) and kernel_size in (3, 5)
    n, cin, h, w = x_nchw.shape
    hidden = cin * expand_ratio
    cout = params["w_proj"].shape[1]
    red = params["w_se1"].shape[1]
    pad = (kernel_size - 1) // 2
    ho = (h + 2 * pad - kernel_size) // stride + 1
    wo = (w + 2 * pad - kernel_size) // stride + 1
    apply_residual = (cin == cout) and (stride == 1)

    vmem_limit = _vmem_limit_bytes()

    # lane-dense (x128) channel sizes for every stored wide tensor; the input
    # channel dim only needs sublane padding (x16) -- it is the contraction
    # dim of K1, never a lane axis of a stored tensor.
    hp, op, rp = (_round_up(c, _LANE) for c in (hidden, cout, red))
    ck = _round_up(cin, 16)

    # ---- boundary layout plumbing (small: cin channels only, bf16 built once)
    # TODO(synk): fold the NCHW read directly into K1 (grid over (image, hw
    # tile), contracting the sublane C axis with dot_general) and the NCHW
    # write into K6 to drop these small plain-JAX passes entirely.
    m = n * h * w
    x_nhwc = jnp.transpose(x_nchw, (0, 2, 3, 1))
    x2d = jnp.pad(x_nhwc, ((0, 0), (0, 0), (0, 0), (0, ck - cin))
                  ).astype(jnp.bfloat16).reshape(m, ck)

    # Zero-padded weights / BN params.  Invariant: padded gamma/beta == 0 and
    # padded weight rows/cols == 0  =>  padded lanes stay exactly 0 through
    # every stage (SE's sigmoid(0)=0.5 multiplies a zero activation), so the
    # [:cout] slice at the end is exact.  Keep this when editing the padding.
    w_exp = jnp.pad(params["w_expand"], ((0, ck - cin), (0, hp - hidden))).astype(jnp.bfloat16)
    w_dw = jnp.pad(params["w_dw"], ((0, 0), (0, hp - hidden))).astype(jnp.float32)
    w_se1 = jnp.pad(params["w_se1"], ((0, hp - hidden), (0, rp - red))).astype(jnp.float32)
    w_se2 = jnp.pad(params["w_se2"], ((0, rp - red), (0, hp - hidden))).astype(jnp.float32)
    w_prj = jnp.pad(params["w_proj"], ((0, hp - hidden), (0, op - cout))).astype(jnp.bfloat16)
    g1p = jnp.pad(params["g1"], ((0, 0), (0, hp - hidden)))
    b1p = jnp.pad(params["b1"], ((0, 0), (0, hp - hidden)))
    g2p = jnp.pad(params["g2"], ((0, 0), (0, hp - hidden)))
    b2p = jnp.pad(params["b2"], ((0, 0), (0, hp - hidden)))
    g3p = jnp.pad(params["g3"], ((0, 0), (0, op - cout)))
    b3p = jnp.pad(params["b3"], ((0, 0), (0, op - cout)))

    # ---- K1: expand matmul + partial BN1 stats (grid over row tiles) -------
    tm1 = _pick_tile(m, _row_cap(2 * (2 * ck + 2 * hp), vmem_limit,
                                 fixed_bytes=2 * ck * hp * 2))
    nt1 = m // tm1
    y1raw, st1 = pl.pallas_call(
        _expand_kernel,
        grid=(nt1,),
        in_specs=[pl.BlockSpec((tm1, ck), lambda i: (i, 0)),
                  pl.BlockSpec((ck, hp), lambda i: (0, 0))],
        out_specs=[pl.BlockSpec((tm1, hp), lambda i: (i, 0)),
                   pl.BlockSpec((1, 2, hp), lambda i: (i, 0, 0))],
        out_shape=[jax.ShapeDtypeStruct((m, hp), jnp.bfloat16),
                   jax.ShapeDtypeStruct((nt1, 2, hp), jnp.float32)],
        compiler_params=_cparams(vmem_limit, "parallel"),
        cost_estimate=pl.CostEstimate(
            flops=2 * m * ck * hp, transcendentals=0,
            bytes_accessed=m * (2 * ck + 2 * hp) + 2 * ck * hp),
    )(x2d, w_exp)
    s1, t1 = _bn_affine(jnp.sum(st1[:, 0, :], axis=0),
                        jnp.sum(st1[:, 1, :], axis=0), m, g1p, b1p)

    # ---- K2: fused BN1+swish + depthwise conv (H-strips) + BN2 stats -------
    y1_nhwc = y1raw.reshape(n, h, w, hp)
    kk = kernel_size * kernel_size
    # strip height: keep the per-strip f32 accumulator around ~1 MiB
    hs = _largest_divisor_leq(ho, max(1, (1 << 20) // (wo * hp * 4)))
    n_strips = ho // hs
    y2raw, st2 = pl.pallas_call(
        functools.partial(_dw_kernel, ksize=kernel_size, stride=stride,
                          pad=pad, hs=hs, n_strips=n_strips),
        grid=(n, n_strips),
        in_specs=[pl.BlockSpec((1, h, w, hp), lambda b, s: (b, 0, 0, 0)),
                  pl.BlockSpec((1, hp), lambda b, s: (0, 0)),
                  pl.BlockSpec((1, hp), lambda b, s: (0, 0)),
                  pl.BlockSpec((kk, hp), lambda b, s: (0, 0))],
        out_specs=[pl.BlockSpec((1, hs, wo, hp), lambda b, s: (b, s, 0, 0)),
                   pl.BlockSpec((1, 2, hp),
                                lambda b, s: (b * n_strips + s, 0, 0))],
        out_shape=[jax.ShapeDtypeStruct((n, ho, wo, hp), jnp.bfloat16),
                   jax.ShapeDtypeStruct((n * n_strips, 2, hp), jnp.float32)],
        scratch_shapes=[pltpu.VMEM((h + 2 * pad, _WOFF + w + pad, hp),
                                   jnp.float32)],
        compiler_params=_cparams(vmem_limit, "parallel", "arbitrary"),
    )(y1_nhwc, s1, t1, w_dw)
    cnt2 = n * ho * wo
    s2, t2 = _bn_affine(jnp.sum(st2[:, 0, :], axis=0),
                        jnp.sum(st2[:, 1, :], axis=0), cnt2, g2p, b2p)

    # ---- K3: fused BN2+swish + SE average pool ------------------------------
    pooled = pl.pallas_call(
        _se_pool_kernel,
        grid=(n,),
        in_specs=[pl.BlockSpec((1, ho, wo, hp), lambda b: (b, 0, 0, 0)),
                  pl.BlockSpec((1, hp), lambda b: (0, 0)),
                  pl.BlockSpec((1, hp), lambda b: (0, 0))],
        out_specs=pl.BlockSpec((1, 1, hp), lambda b: (b, 0, 0)),
        out_shape=jax.ShapeDtypeStruct((n, 1, hp), jnp.float32),
        compiler_params=_cparams(vmem_limit, "parallel"),
    )(y2raw, s2, t2)

    # ---- K4: SE FCs (tiny; whole arrays fit trivially in VMEM) --------------
    _vmem = pl.BlockSpec(memory_space=pltpu.MemorySpace.VMEM)
    se_scale = pl.pallas_call(
        _se_fc_kernel,
        in_specs=[_vmem] * 3,
        out_specs=_vmem,
        out_shape=jax.ShapeDtypeStruct((n, hp), jnp.float32),
    )(pooled.reshape(n, hp), w_se1, w_se2)

    # ---- K5: fused BN2+swish + SE scale + project matmul + BN3 stats --------
    mo_img = ho * wo
    tm2 = _pick_tile(mo_img, _row_cap(2 * (2 * hp + 2 * op), vmem_limit,
                                      fixed_bytes=2 * hp * op * 2))
    nt2 = mo_img // tm2
    y2r3 = y2raw.reshape(n, mo_img, hp)
    se3 = se_scale.reshape(n, 1, hp)
    y3raw, st3 = pl.pallas_call(
        _project_kernel,
        grid=(n, nt2),
        in_specs=[pl.BlockSpec((1, tm2, hp), lambda b, j: (b, j, 0)),
                  pl.BlockSpec((1, hp), lambda b, j: (0, 0)),
                  pl.BlockSpec((1, hp), lambda b, j: (0, 0)),
                  pl.BlockSpec((1, 1, hp), lambda b, j: (b, 0, 0)),
                  pl.BlockSpec((hp, op), lambda b, j: (0, 0))],
        out_specs=[pl.BlockSpec((1, tm2, op), lambda b, j: (b, j, 0)),
                   pl.BlockSpec((1, 2, op), lambda b, j: (b * nt2 + j, 0, 0))],
        out_shape=[jax.ShapeDtypeStruct((n, mo_img, op), jnp.bfloat16),
                   jax.ShapeDtypeStruct((n * nt2, 2, op), jnp.float32)],
        compiler_params=_cparams(vmem_limit, "parallel", "parallel"),
        cost_estimate=pl.CostEstimate(
            flops=2 * n * mo_img * hp * op,
            transcendentals=n * mo_img * hp,
            bytes_accessed=n * mo_img * (2 * hp + 2 * op) + 2 * hp * op),
    )(y2r3, s2, t2, se3, w_prj)
    cnt3 = n * mo_img
    s3, t3 = _bn_affine(jnp.sum(st3[:, 0, :], axis=0),
                        jnp.sum(st3[:, 1, :], axis=0), cnt3, g3p, b3p)

    # ---- K6: BN3 apply -------------------------------------------------------
    mo = n * mo_img
    tm3 = _pick_tile(mo, _row_cap(2 * (2 * op) + 2 * (4 * op), vmem_limit))
    nt3 = mo // tm3
    y3_2d = y3raw.reshape(mo, op)
    out2d = pl.pallas_call(
        _bn_out_kernel,
        grid=(nt3,),
        in_specs=[pl.BlockSpec((tm3, op), lambda i: (i, 0)),
                  pl.BlockSpec((1, op), lambda i: (0, 0)),
                  pl.BlockSpec((1, op), lambda i: (0, 0))],
        out_specs=pl.BlockSpec((tm3, op), lambda i: (i, 0)),
        out_shape=jax.ShapeDtypeStruct((mo, op), jnp.float32),
        compiler_params=_cparams(vmem_limit, "parallel"),
    )(y3_2d, s3, t3)

    out = out2d.reshape(n, ho, wo, op)[:, :, :, :cout]
    out = jnp.transpose(out, (0, 3, 1, 2))            # back to NCHW (PyTorch parity)
    if apply_residual:
        # exact f32 residual add on the small unpadded tensors (cheaper than
        # reading a 128-lane padded residual copy inside K6).
        out = out + x_nchw
    return out


# ---------------------------------------------------------------------------
# Deterministic synthetic parameters (PyTorch-logical shapes, unpadded)
# ---------------------------------------------------------------------------
def init_params(key, inp, oup, kernel_size, expand_ratio):
    hidden = inp * expand_ratio
    red = hidden // 4
    ks = jax.random.split(key, 12)

    def nrm(k, shape, scale):
        return (scale * jax.random.normal(k, shape)).astype(jnp.float32)

    return {
        "w_expand": nrm(ks[0], (inp, hidden), 1.0 / math.sqrt(inp)),
        "g1": (1.0 + 0.1 * jax.random.normal(ks[1], (1, hidden))).astype(jnp.float32),
        "b1": nrm(ks[2], (1, hidden), 0.1),
        "w_dw": nrm(ks[3], (kernel_size * kernel_size, hidden), 1.0 / kernel_size),
        "g2": (1.0 + 0.1 * jax.random.normal(ks[4], (1, hidden))).astype(jnp.float32),
        "b2": nrm(ks[5], (1, hidden), 0.1),
        "w_se1": nrm(ks[6], (hidden, red), 1.0 / math.sqrt(hidden)),
        "w_se2": nrm(ks[7], (red, hidden), 1.0 / math.sqrt(red)),
        "w_proj": nrm(ks[8], (hidden, oup), 1.0 / math.sqrt(hidden)),
        "g3": (1.0 + 0.1 * jax.random.normal(ks[9], (1, oup))).astype(jnp.float32),
        "b3": nrm(ks[10], (1, oup), 0.1),
    }


if __name__ == "__main__":
    key = jax.random.PRNGKey(0)
    kx, kp1, kp2 = jax.random.split(key, 3)

    N, Cin, H, W = 2, 4, 16, 16
    x = jax.random.normal(kx, (N, Cin, H, W), dtype=jnp.float32)

    # Config 1: MBConvBlock(4, 4, kernel_size=3, stride=1, expand_ratio=4)
    #           -> residual path
    params1 = init_params(kp1, Cin, 4, 3, 4)
    out1 = mbconv_forward(x, params1, kernel_size=3, stride=1, expand_ratio=4)
    out1 = jax.block_until_ready(out1)
    assert out1.shape == (N, 4, H, W), out1.shape
    assert bool(jnp.all(jnp.isfinite(out1)))

    # Config 2: MBConvBlock(4, 8, kernel_size=5, stride=2, expand_ratio=4)
    #           -> in-kernel strided depthwise, no residual
    params2 = init_params(kp2, Cin, 8, 5, 4)
    out2 = mbconv_forward(x, params2, kernel_size=5, stride=2, expand_ratio=4)
    out2 = jax.block_until_ready(out2)
    assert out2.shape == (N, 8, H // 2, W // 2), out2.shape
    assert bool(jnp.all(jnp.isfinite(out2)))

    print("KERNEL_OK")
</pallas_src>

<mosaic_0001>
module attributes {stable_mosaic.version = 11 : i64} {
  func.func @_expand_kernel(%arg0: i32, %arg1: memref<512x16xbf16, #tpu.memory_space<vmem>>, %arg2: memref<16x128xbf16, #tpu.memory_space<vmem>>, %arg3: memref<512x128xbf16, #tpu.memory_space<vmem>>, %arg4: memref<1x2x128xf32, #tpu.memory_space<vmem>>) attributes {dimension_semantics = [#tpu.dimension_semantics<parallel>], iteration_bounds = array<i64: 1>, scalar_prefetch = 0 : i64, scratch_operands = 0 : i64, tpu.core_type = #tpu.core_type<tc>, window_params = [{transform_indices = @transform_0, window_bounds = array<i64: 512, 16>}, {pipeline_mode = #tpu.pipeline_mode<synchronous>, transform_indices = @transform_1, window_bounds = array<i64: 16, 128>}, {transform_indices = @transform_2, window_bounds = array<i64: 512, 128>}, {transform_indices = @transform_3, window_bounds = array<i64: 1, 2, 128>}]} {
    %c0 = arith.constant 0 : index
    %c0_0 = arith.constant 0 : index
    %0 = vector.load %arg1[%c0, %c0_0] : memref<512x16xbf16, #tpu.memory_space<vmem>>, vector<512x16xbf16>
    %c0_1 = arith.constant 0 : index
    %c0_2 = arith.constant 0 : index
    %1 = vector.load %arg2[%c0_1, %c0_2] : memref<16x128xbf16, #tpu.memory_space<vmem>>, vector<16x128xbf16>
    %cst = arith.constant dense<0.000000e+00> : vector<512x128xf32>
    %2 = tpu.matmul %0, %1, %cst {dimension_numbers = #tpu.dot_dimension_numbers<[1], [0], [0], [1], [0, 0, 1, 1], [], []>} : vector<512x16xbf16>, vector<16x128xbf16>, vector<512x128xf32> -> vector<512x128xf32>
    %3 = arith.truncf %2 : vector<512x128xf32> to vector<512x128xbf16>
    %c0_3 = arith.constant 0 : index
    %c0_4 = arith.constant 0 : index
    %4 = vector.load %arg3[%c0_3, %c0_4] : memref<512x128xbf16, #tpu.memory_space<vmem>>, vector<512x128xbf16>
    tpu.vector_store %arg3[%c0_3, %c0_4], %3 {strides = array<i32>} : memref<512x128xbf16, #tpu.memory_space<vmem>>, vector<512x128xbf16>,
    %cst_5 = arith.constant dense<0.000000e+00> : vector<128xf32>
    %5 = vector.multi_reduction <add>, %2, %cst_5 [0] : vector<512x128xf32> to vector<128xf32>
    %6 = vector.shape_cast %5 : vector<128xf32> to vector<1x128xf32>
    %7 = arith.mulf %2, %2 : vector<512x128xf32>
    %cst_6 = arith.constant dense<0.000000e+00> : vector<128xf32>
    %8 = vector.multi_reduction <add>, %7, %cst_6 [0] : vector<512x128xf32> to vector<128xf32>
    %9 = vector.shape_cast %8 : vector<128xf32> to vector<1x128xf32>
    %10 = tpu.concatenate %6, %9 in 0 : vector<1x128xf32>, vector<1x128xf32> -> vector<2x128xf32>
    %c0_7 = arith.constant 0 : index
    %c0_8 = arith.constant 0 : index
    %c0_9 = arith.constant 0 : index
    %11 = vector.load %arg4[%c0_7, %c0_8, %c0_9] : memref<1x2x128xf32, #tpu.memory_space<vmem>>, vector<1x2x128xf32>
    %12 = vector.shape_cast %11 : vector<1x2x128xf32> to vector<2x128xf32>
    %13 = vector.shape_cast %10 : vector<2x128xf32> to vector<1x2x128xf32>
    tpu.vector_store %arg4[%c0_7, %c0_8, %c0_9], %13 {strides = array<i32>} : memref<1x2x128xf32, #tpu.memory_space<vmem>>, vector<1x2x128xf32>,
    return
  }
  func.func @transform_0(%arg0: i32) -> (i32, i32) {
    %c0_i32 = arith.constant 0 : i32
    %c0_i32_0 = arith.constant 0 : i32
    return %arg0, %c0_i32 : i32, i32
  }
  func.func @transform_1(%arg0: i32) -> (i32, i32) {
    %c0_i32 = arith.constant 0 : i32
    %c0_i32_0 = arith.constant 0 : i32
    %c0_i32_1 = arith.constant 0 : i32
    return %c0_i32, %c0_i32_0 : i32, i32
  }
  func.func @transform_2(%arg0: i32) -> (i32, i32) {
    %c0_i32 = arith.constant 0 : i32
    %c0_i32_0 = arith.constant 0 : i32
    return %arg0, %c0_i32 : i32, i32
  }
  func.func @transform_3(%arg0: i32) -> (i32, i32, i32) {
    %c0_i32 = arith.constant 0 : i32
    %c0_i32_0 = arith.constant 0 : i32
    %c0_i32_1 = arith.constant 0 : i32
    return %arg0, %c0_i32, %c0_i32_0 : i32, i32, i32
  }
}

</mosaic_0001>

<bundles_post_ra>
// kernel: tpu_custom_call.1
= control target key start
LH: loop header
LB: loop body
LE: loop exit
PB: predicated region body
PF: predicated region fallthrough
CT: control target
= control target key end

     0   :  { %9 = vsyncpa [#allocation3], 0  ;;  %s1783_s0 = inlined_call_operand.vmem [shape: bf16[512,16], index: 0, kind: input, shape index: {}]   ;;  %s1784_s1 = inlined_call_operand.vmem [shape: bf16[16,128], index: 1, kind: input, shape index: {}]   ;;  %s1785_s2 = inlined_call_operand.hbm [shape: bf16[512,128], index: 2, kind: output, shape index: {0}]   ;;  %s1786_s3 = inlined_call_operand.hbm [shape: f32[1,2,128], index: 3, kind: output, shape index: {1}]  }
   0x1   :  { %v1077_v0 = vld [vmem:[%s1784_s1] sm:$0xff] }
   0x2   :  { %v1045_v1 = vld [vmem:[%s1783_s0] sm:$0xff] }
   0x3   :  { %v1053_v2 = vld [vmem:[%s1783_s0 + $0x40] sm:$0xff] }
   0x4   :  { %10 = vsyncpa [#allocation5], 0  ;;  %352 = vmatpush.bf16.msra.mxu0 %v1077_v0  ;;  %vm248_vm0 = vcmask 130048   ;;  %1269 = vmatpush.bf16.msra.mxu1 %v1077_v0  ;;  %v1046_v3 = vld [vmem:[%s1783_s0 + $0x8] sm:$0xff]  ;;  %v1061_v5 = vld [vmem:[%s1783_s0 + $0x80] sm:$0xff]  ;;  %s853_s24 = sshll.u32 %s1785_s2, 4  ;;  %s854_s24 = int_to_ptr.hbm [resolvable:$true] %s853_s24 }
   0x5   :  { %1270 = vmatpush.bf16.msra.mxu2 %v1077_v0  ;;  %1271 = vmatpush.bf16.msra.mxu3 %v1077_v0  ;;  %v1054_v4 = vld [vmem:[%s1783_s0 + $0x48] sm:$0xff]  ;;  %v1047_v6 = vld [vmem:[%s1783_s0 + $0x10] sm:$0xff]  ;;  %v1048_v9 = vld [vmem:[%s1783_s0 + $0x18] sm:$0xff]  ;;  %s1329_s2 = smov 64   ;;  %s1330_s25 = smov 4   ;;  %vm844_vm1 = vcmask 1040384  }
   0x6   :  { %v1055_v7 = vld [vmem:[%s1783_s0 + $0x50] sm:$0xff]  ;;  %v1062_v8 = vld [vmem:[%s1783_s0 + $0x88] sm:$0xff]  ;;  %v1056_v10 = vld [vmem:[%s1783_s0 + $0x58] sm:$0xff]  ;;  %s1331_s26 = smov [#allocation4]   ;;  %s867_s30 = sshll.u32 %s1786_s3, 4  ;;  %s868_s30 = int_to_ptr.hbm [resolvable:$true] %s867_s30 }
   0x7   :  { %1013 = vmatmul.msk.bf16.vlgmr.msra.gmra.mxu0 %vm248_vm0, %v1045_v1  ;;  %1021 = vmatmul.msk.bf16.vlgmr.msra.gmra.mxu1 %vm248_vm0, %v1053_v2  ;;  %v1063_v11 = vld [vmem:[%s1783_s0 + $0x90] sm:$0xff]  ;;  %v1069_v12 = vld [vmem:[%s1783_s0 + $0xc0] sm:$0xff]  ;;  %v1064_v15 = vld [vmem:[%s1783_s0 + $0x98] sm:$0xff]  ;;  %s865_s27 = sshll.u32 %s1331_s26, 4  ;;  %s866_s27 = int_to_ptr.vmem [resolvable:$true] %s865_s27 }
   0x8   :  { %1029 = vmatmul.msk.bf16.vlgmr.msra.gmra.mxu2 %vm248_vm0, %v1061_v5  ;;  %1037 = vmatmul.msk.bf16.vlgmr.msra.gmra.mxu3 %vm248_vm0, %v1069_v12  ;;  %v1049_v13 = vld [vmem:[%s1783_s0 + $0x20] sm:$0xff]  ;;  %v1070_v16 = vld [vmem:[%s1783_s0 + $0xc8] sm:$0xff]  ;;  %v1071_v20 = vld [vmem:[%s1783_s0 + $0xd0] sm:$0xff] }
   0x9   :  { %v1057_v14 = vld [vmem:[%s1783_s0 + $0x60] sm:$0xff]  ;;  %v1050_v17 = vld [vmem:[%s1783_s0 + $0x28] sm:$0xff]  ;;  %v1051_v21 = vld [vmem:[%s1783_s0 + $0x30] sm:$0xff] }
   0xa   :  { %v1058_v18 = vld [vmem:[%s1783_s0 + $0x68] sm:$0xff]  ;;  %v1065_v19 = vld [vmem:[%s1783_s0 + $0xa0] sm:$0xff]  ;;  %v1059_v22 = vld [vmem:[%s1783_s0 + $0x70] sm:$0xff] }
   0xb   :  { %v1066_v23 = vld [vmem:[%s1783_s0 + $0xa8] sm:$0xff]  ;;  %v1072_v24 = vld [vmem:[%s1783_s0 + $0xd8] sm:$0xff]  ;;  %v1067_v27 = vld [vmem:[%s1783_s0 + $0xb0] sm:$0xff] }
   0xc   :  { %v1052_v25 = vld [vmem:[%s1783_s0 + $0x38] sm:$0xff]  ;;  %v1073_v28 = vld [vmem:[%s1783_s0 + $0xe0] sm:$0xff]  ;;  %v1074_v32 = vld [vmem:[%s1783_s0 + $0xe8] sm:$0xff] }
   0xd   :  { %v1060_v26 = vld [vmem:[%s1783_s0 + $0x78] sm:$0xff]  ;;  %v1075_v46 = vld [vmem:[%s1783_s0 + $0xf0] sm:$0xff] }
   0xe   :  { %v1068_v31 = vld [vmem:[%s1783_s0 + $0xb8] sm:$0xff] }
   0xf   :  { %v1076_v62 = vld [vmem:[%s1783_s0 + $0xf8] sm:$0xff]  ;;  %s1328_s0 = smov [#allocation2]  }
  0x10   :  { %s851_s21 = sshll.u32 %s1328_s0, 4  ;;  %s852_s21 = int_to_ptr.vmem [resolvable:$true] %s851_s21 }
  0x17   :  { %1014 = vmatmul.msk.bf16.gmra.mxu0 %vm248_vm0, %v1046_v3  ;;  %1022 = vmatmul.msk.bf16.gmra.mxu1 %vm248_vm0, %v1054_v4 }
  0x18   :  { %1030 = vmatmul.msk.bf16.gmra.mxu2 %vm248_vm0, %v1062_v8  ;;  %1038 = vmatmul.msk.bf16.gmra.mxu3 %vm248_vm0, %v1070_v16 }
  0x27   :  { %1015 = vmatmul.msk.bf16.gmra.mxu0 %vm248_vm0, %v1047_v6  ;;  %1023 = vmatmul.msk.bf16.gmra.mxu1 %vm248_vm0, %v1055_v7 }
  0x28   :  { %1031 = vmatmul.msk.bf16.gmra.mxu2 %vm248_vm0, %v1063_v11  ;;  %1039 = vmatmul.msk.bf16.gmra.mxu3 %vm248_vm0, %v1071_v20 }
  0x37   :  { %1016 = vmatmul.msk.bf16.gmra.mxu0 %vm248_vm0, %v1048_v9  ;;  %1024 = vmatmul.msk.bf16.gmra.mxu1 %vm248_vm0, %v1056_v10 }
  0x38   :  { %1032 = vmatmul.msk.bf16.gmra.mxu2 %vm248_vm0, %v1064_v15  ;;  %1040 = vmatmul.msk.bf16.gmra.mxu3 %vm248_vm0, %v1072_v24 }
  0x47   :  { %1017 = vmatmul.msk.bf16.gmra.mxu0 %vm248_vm0, %v1049_v13  ;;  %1025 = vmatmul.msk.bf16.gmra.mxu1 %vm248_vm0, %v1057_v14 }
  0x48   :  { %1033 = vmatmul.msk.bf16.gmra.mxu2 %vm248_vm0, %v1065_v19  ;;  %1041 = vmatmul.msk.bf16.gmra.mxu3 %vm248_vm0, %v1073_v28 }
  0x57   :  { %1018 = vmatmul.msk.bf16.gmra.mxu0 %vm248_vm0, %v1050_v17  ;;  %1026 = vmatmul.msk.bf16.gmra.mxu1 %vm248_vm0, %v1058_v18 }
  0x58   :  { %1034 = vmatmul.msk.bf16.gmra.mxu2 %vm248_vm0, %v1066_v23  ;;  %1042 = vmatmul.msk.bf16.gmra.mxu3 %vm248_vm0, %v1074_v32 }
  0x67   :  { %1019 = vmatmul.msk.bf16.gmra.mxu0 %vm248_vm0, %v1051_v21  ;;  %1027 = vmatmul.msk.bf16.gmra.mxu1 %vm248_vm0, %v1059_v22 }
  0x68   :  { %1035 = vmatmul.msk.bf16.gmra.mxu2 %vm248_vm0, %v1067_v27  ;;  %1043 = vmatmul.msk.bf16.gmra.mxu3 %vm248_vm0, %v1075_v46 }
  0x77   :  { %1020 = vmatmul.msk.bf16.gmra.mxu0 %vm248_vm0, %v1052_v25  ;;  %1028 = vmatmul.msk.bf16.gmra.mxu1 %vm248_vm0, %v1060_v26 }
  0x78   :  { %1036 = vmatmul.msk.bf16.gmra.mxu2 %vm248_vm0, %v1068_v31  ;;  %1044 = vmatmul.msk.bf16.gmra.mxu3 %vm248_vm0, %v1076_v62 }
  0x84   :  { %v354_v29 = vpop.f32.mrf.mxu0  ;;  %v1467_v30 = vpop.f32.mrf.mxu1 }
  0x85   :  { %v711_v33 = vmul.f32 %v354_v29, %v354_v29 }
  0x8b   :  { %v1491_v53 = vpop.f32.mrf.mxu2  ;;  %v1525_v13 = vpop.f32.mrf.mxu3 }
  0x8c   :  { %v356_v34 = vpop.f32.mrf.mxu0  ;;  %v1477_v35 = vpop.f32.mrf.mxu1 }
  0x8d   :  { %v1081_v36 = vpack.c.bf16 %v356_v34, %v354_v29  ;;  %v642_v37 = vadd.f32 %v356_v34, %v354_v29  ;;  %v712_v38 = vmul.f32 %v356_v34, %v356_v34  ;;  %v1121_v39 = vpack.c.bf16 %v1477_v35, %v1467_v30 }
  0x8f   :  { %1082 = vst [vmem:[#allocation2] sm:$0xff] %v1081_v36   ;;  %v775_v40 = vadd.f32 %v712_v38, %v711_v33 }
  0x90   :  { %1245 = vst [vmem:[#allocation2 + $0x40] sm:$0xff] %v1121_v39  }
  0x93   :  { %v1497_v59 = vpop.f32.mrf.mxu2  ;;  %v1531_v17 = vpop.f32.mrf.mxu3 }
  0x94   :  { %v359_v41 = vpop.f32.mrf.mxu0  ;;  %v1481_v42 = vpop.f32.mrf.mxu1  ;;  %v1161_v60 = vpack.c.bf16 %v1497_v59, %v1491_v53  ;;  %v1201_v19 = vpack.c.bf16 %v1531_v17, %v1525_v13 }
  0x95   :  { %v643_v43 = vadd.f32 %v642_v37, %v359_v41  ;;  %v713_v44 = vmul.f32 %v359_v41, %v359_v41 }
  0x96   :  { %1253 = vst [vmem:[#allocation2 + $0x80] sm:$0xff] %v1161_v60  }
  0x97   :  { %v776_v45 = vadd.f32 %v775_v40, %v713_v44  ;;  %1261 = vst [vmem:[#allocation2 + $0xc0] sm:$0xff] %v1201_v19  }
  0x9b   :  { %v1511_v3 = vpop.f32.mrf.mxu2  ;;  %v1543_v25 = vpop.f32.mrf.mxu3 }
  0x9c   :  { %v361_v47 = vpop.f32.mrf.mxu0  ;;  %v1487_v48 = vpop.f32.mrf.mxu1 }
  0x9d   :  { %v1086_v49 = vpack.c.bf16 %v361_v47, %v359_v41  ;;  %v644_v50 = vadd.f32 %v643_v43, %v361_v47  ;;  %v714_v51 = vmul.f32 %v361_v47, %v361_v47  ;;  %v1126_v52 = vpack.c.bf16 %v1487_v48, %v1481_v42 }
  0x9f   :  { %1238 = vst [vmem:[#allocation2 + $0x8] sm:$0xff] %v1086_v49   ;;  %v777_v54 = vadd.f32 %v776_v45, %v714_v51 }
  0xa0   :  { %1246 = vst [vmem:[#allocation2 + $0x48] sm:$0xff] %v1126_v52  }
  0xa3   :  { %v1515_v6 = vpop.f32.mrf.mxu2  ;;  %v1549_v29 = vpop.f32.mrf.mxu3 }
  0xa4   :  { %v364_v55 = vpop.f32.mrf.mxu0  ;;  %v1493_v56 = vpop.f32.mrf.mxu1  ;;  %v1166_v7 = vpack.c.bf16 %v1515_v6, %v1511_v3  ;;  %v1206_v32 = vpack.c.bf16 %v1549_v29, %v1543_v25 }
  0xa5   :  { %v1495_v57 = vadd.f32 %v644_v50, %v364_v55  ;;  %v715_v58 = vmul.f32 %v364_v55, %v364_v55 }
  0xa6   :  { %1254 = vst [vmem:[#allocation2 + $0x88] sm:$0xff] %v1166_v7  }
  0xa7   :  { %v1501_v61 = vadd.f32 %v777_v54, %v715_v58  ;;  %1262 = vst [vmem:[#allocation2 + $0xc8] sm:$0xff] %v1206_v32  }
  0xab   :  { %v1523_v12 = vpop.f32.mrf.mxu2  ;;  %v1561_v39 = vpop.f32.mrf.mxu3 }
  0xac   :  { %v366_v63 = vpop.f32.mrf.mxu0  ;;  %v1507_v0 = vpop.f32.mrf.mxu1 }
  0xad   :  { %v1091_v1 = vpack.c.bf16 %v366_v63, %v364_v55  ;;  %v1131_v2 = vpack.c.bf16 %v1507_v0, %v1493_v56  ;;  %v716_v45 = vmul.f32 %v366_v63, %v366_v63  ;;  %v646_v50 = vadd.f32 %v1495_v57, %v366_v63 }
  0xaf   :  { %1239 = vst [vmem:[#allocation2 + $0x10] sm:$0xff] %v1091_v1   ;;  %v779_v51 = vadd.f32 %v1501_v61, %v716_v45 }
  0xb0   :  { %1247 = vst [vmem:[#allocation2 + $0x50] sm:$0xff] %v1131_v2  }
  0xb3   :  { %v1529_v16 = vpop.f32.mrf.mxu2  ;;  %v1567_v44 = vpop.f32.mrf.mxu3 }
  0xb4   :  { %v369_v4 = vpop.f32.mrf.mxu0  ;;  %v1513_v5 = vpop.f32.mrf.mxu1  ;;  %v1171_v18 = vpack.c.bf16 %v1529_v16, %v1523_v12  ;;  %v1211_v47 = vpack.c.bf16 %v1567_v44, %v1561_v39 }
  0xb5   :  { %v717_v49 = vmul.f32 %v369_v4, %v369_v4  ;;  %v647_v54 = vadd.f32 %v646_v50, %v369_v4 }
  0xb6   :  { %1255 = vst [vmem:[#allocation2 + $0x90] sm:$0xff] %v1171_v18  }
  0xb7   :  { %1263 = vst [vmem:[#allocation2 + $0xd0] sm:$0xff] %v1211_v47   ;;  %v780_v55 = vadd.f32 %v779_v51, %v717_v49 }
  0xbb   :  { %v1541_v24 = vpop.f32.mrf.mxu2 }
  0xbc   :  { %v371_v8 = vpop.f32.mrf.mxu0  ;;  %v1519_v9 = vpop.f32.mrf.mxu1 }
  0xbd   :  { %v1096_v10 = vpack.c.bf16 %v371_v8, %v369_v4  ;;  %v1136_v11 = vpack.c.bf16 %v1519_v9, %v1513_v5  ;;  %v718_v52 = vmul.f32 %v371_v8, %v371_v8  ;;  %v648_v1 = vadd.f32 %v647_v54, %v371_v8 }
  0xbf   :  { %1240 = vst [vmem:[#allocation2 + $0x18] sm:$0xff] %v1096_v10   ;;  %v781_v57 = vadd.f32 %v780_v55, %v718_v52 }
  0xc0   :  { %1248 = vst [vmem:[#allocation2 + $0x58] sm:$0xff] %v1136_v11   ;;  %v1581_v11 = vpop.f32.mrf.mxu3 }
  0xc3   :  { %v1547_v28 = vpop.f32.mrf.mxu2 }
  0xc4   :  { %v374_v14 = vpop.f32.mrf.mxu0  ;;  %v1527_v15 = vpop.f32.mrf.mxu1  ;;  %v1176_v31 = vpack.c.bf16 %v1547_v28, %v1541_v24 }
  0xc5   :  { %v719_v58 = vmul.f32 %v374_v14, %v374_v14  ;;  %v649_v18 = vadd.f32 %v648_v1, %v374_v14 }
  0xc6   :  { %1256 = vst [vmem:[#allocation2 + $0x98] sm:$0xff] %v1176_v31  }
  0xc7   :  { %v782_v61 = vadd.f32 %v781_v57, %v719_v58 }
  0xc8   :  { %v1587_v47 = vpop.f32.mrf.mxu3 }
  0xcb   :  { %v1559_v38 = vpop.f32.mrf.mxu2 }
  0xcc   :  { %v376_v20 = vpop.f32.mrf.mxu0  ;;  %v1537_v21 = vpop.f32.mrf.mxu1 }
  0xcd   :  { %v1101_v22 = vpack.c.bf16 %v376_v20, %v374_v14  ;;  %v1141_v23 = vpack.c.bf16 %v1537_v21, %v1527_v15  ;;  %v720_v63 = vmul.f32 %v376_v20, %v376_v20  ;;  %v650_v19 = vadd.f32 %v649_v18, %v376_v20 }
  0xce   :  { %v1216_v20 = vpack.c.bf16 %v1587_v47, %v1581_v11 }
  0xcf   :  { %1241 = vst [vmem:[#allocation2 + $0x20] sm:$0xff] %v1101_v22   ;;  %v783_v22 = vadd.f32 %v782_v61, %v720_v63 }
  0xd0   :  { %1249 = vst [vmem:[#allocation2 + $0x60] sm:$0xff] %v1141_v23  }
  0xd1   :  { %1264 = vst [vmem:[#allocation2 + $0xd8] sm:$0xff] %v1216_v20  }
  0xd3   :  { %v1565_v43 = vpop.f32.mrf.mxu2 }
  0xd4   :  { %v379_v26 = vpop.f32.mrf.mxu0  ;;  %v1545_v27 = vpop.f32.mrf.mxu1  ;;  %v1181_v46 = vpack.c.bf16 %v1565_v43, %v1559_v38 }
  0xd5   :  { %v721_v4 = vmul.f32 %v379_v26, %v379_v26  ;;  %v651_v31 = vadd.f32 %v650_v19, %v379_v26 }
  0xd6   :  { %1257 = vst [vmem:[#allocation2 + $0xa0] sm:$0xff] %v1181_v46  }
  0xd7   :  { %v784_v8 = vadd.f32 %v783_v22, %v721_v4  ;;  %v728_v22 = vmul.f32 %v1477_v35, %v1477_v35 }
  0xdb   :  { %v1579_v10 = vpop.f32.mrf.mxu2 }
  0xdc   :  { %v381_v33 = vpop.f32.mrf.mxu0  ;;  %v1555_v34 = vpop.f32.mrf.mxu1 }
  0xdd   :  { %v1106_v36 = vpack.c.bf16 %v381_v33, %v379_v26  ;;  %v1146_v37 = vpack.c.bf16 %v1555_v34, %v1545_v27  ;;  %v722_v23 = vmul.f32 %v381_v33, %v381_v33  ;;  %v652_v45 = vadd.f32 %v651_v31, %v381_v33 }
  0xdf   :  { %1242 = vst [vmem:[#allocation2 + $0x28] sm:$0xff] %v1106_v36   ;;  %v785_v49 = vadd.f32 %v784_v8, %v722_v23  ;;  %v729_v8 = vmul.f32 %v1481_v42, %v1481_v42 }
  0xe0   :  { %1250 = vst [vmem:[#allocation2 + $0x68] sm:$0xff] %v1146_v37  }
  0xe3   :  { %v1585_v46 = vpop.f32.mrf.mxu2 }
  0xe4   :  { %v384_v40 = vpop.f32.mrf.mxu0  ;;  %v1563_v41 = vpop.f32.mrf.mxu1  ;;  %v1186_v50 = vpack.c.bf16 %v1585_v46, %v1579_v10 }
  0xe5   :  { %v723_v32 = vmul.f32 %v384_v40, %v384_v40  ;;  %v653_v51 = vadd.f32 %v652_v45, %v384_v40  ;;  %v730_v45 = vmul.f32 %v1487_v48, %v1487_v48 }
  0xe6   :  { %1258 = vst [vmem:[#allocation2 + $0xa8] sm:$0xff] %v1186_v50  }
  0xe7   :  { %v786_v26 = vadd.f32 %v785_v49, %v723_v32 }
  0xeb   :  { %v1597_v61 = vpop.f32.mrf.mxu2 }
  0xec   :  { %v386_v60 = vpop.f32.mrf.mxu0  ;;  %v1575_v62 = vpop.f32.mrf.mxu1 }
  0xed   :  { %v1111_v2 = vpack.c.bf16 %v386_v60, %v384_v40  ;;  %v1151_v7 = vpack.c.bf16 %v1575_v62, %v1563_v41  ;;  %v724_v14 = vmul.f32 %v386_v60, %v386_v60  ;;  %v654_v54 = vadd.f32 %v653_v51, %v386_v60  ;;  %v1599_v40 = vpop.f32.mrf.mxu3 }
  0xee   :  { %v727_v60 = vmul.f32 %v1467_v30, %v1467_v30 }
  0xef   :  { %1243 = vst [vmem:[#allocation2 + $0x30] sm:$0xff] %v1111_v2   ;;  %v787_v55 = vadd.f32 %v786_v26, %v724_v14 }
  0xf0   :  { %1251 = vst [vmem:[#allocation2 + $0x70] sm:$0xff] %v1151_v7  }
  0xf3   :  { %v1613_v14 = vpop.f32.mrf.mxu2 }
  0xf4   :  { %v389_v36 = vpop.f32.mrf.mxu0  ;;  %v1583_v37 = vpop.f32.mrf.mxu1 }
  0xf5   :  { %v725_v52 = vmul.f32 %v389_v36, %v389_v36  ;;  %v655_v33 = vadd.f32 %v654_v54, %v389_v36  ;;  %v1615_v50 = vpop.f32.mrf.mxu3 }
  0xf6   :  { %v1221_v20 = vpack.c.bf16 %v1615_v50, %v1599_v40 }
  0xf7   :  { %v788_v58 = vadd.f32 %v787_v55, %v725_v52  ;;  %v733_v55 = vmul.f32 %v1513_v5, %v1513_v5 }
  0xf8   :  { %1265 = vst [vmem:[#allocation2 + $0xe0] sm:$0xff] %v1221_v20   ;;  %v740_v20 = vmul.f32 %v1575_v62, %v1575_v62 }
  0xfc   :  { %v391_v1 = vpop.f32.mrf.mxu0  ;;  %v1593_v2 = vpop.f32.mrf.mxu1 }
  0xfd   :  { %v1116_v7 = vpack.c.bf16 %v391_v1, %v389_v36  ;;  %v656_v57 = vadd.f32 %v655_v33, %v391_v1  ;;  %v726_v63 = vmul.f32 %v391_v1, %v391_v1  ;;  %v1156_v18 = vpack.c.bf16 %v1593_v2, %v1583_v37 }
  0xfe   :  { %v734_v1 = vmul.f32 %v1519_v9, %v1519_v9 }
  0xff   :  { %1244 = vst [vmem:[#allocation2 + $0x38] sm:$0xff] %v1116_v7   ;;  %v657_v4 = vadd.f32 %v656_v57, %v1467_v30  ;;  %v789_v19 = vadd.f32 %v788_v58, %v726_v63  ;;  %v1633_v57 = vpop.f32.mrf.mxu2  ;;  %v1635_v63 = vpop.f32.mrf.mxu3 }
 0x100   :  { %1252 = vst [vmem:[#allocation2 + $0x78] sm:$0xff] %v1156_v18  }
 0x101   :  { %v658_v23 = vadd.f32 %v657_v4, %v1477_v35  ;;  %v790_v31 = vadd.f32 %v789_v19, %v727_v60  ;;  %v1191_v35 = vpack.c.bf16 %v1613_v14, %v1597_v61  ;;  %v736_v4 = vmul.f32 %v1537_v21, %v1537_v21 }
 0x103   :  { %v659_v32 = vadd.f32 %v658_v23, %v1481_v42  ;;  %v791_v36 = vadd.f32 %v790_v31, %v728_v22  ;;  %v731_v42 = vmul.f32 %v1493_v56, %v1493_v56  ;;  %1259 = vst [vmem:[#allocation2 + $0xb0] sm:$0xff] %v1191_v35   ;;  %v738_v31 = vmul.f32 %v1555_v34, %v1555_v34 }
 0x105   :  { %v660_v49 = vadd.f32 %v659_v32, %v1487_v48  ;;  %v792_v30 = vadd.f32 %v791_v36, %v729_v8  ;;  %v732_v48 = vmul.f32 %v1507_v0, %v1507_v0 }
 0x107   :  { %v661_v51 = vadd.f32 %v660_v49, %v1493_v56  ;;  %v793_v26 = vadd.f32 %v792_v30, %v730_v45  ;;  %v1651_v36 = vpop.f32.mrf.mxu3 }
 0x108   :  { %v1226_v45 = vpack.c.bf16 %v1651_v36, %v1635_v63 }
 0x109   :  { %v662_v52 = vadd.f32 %v661_v51, %v1507_v0  ;;  %v794_v54 = vadd.f32 %v793_v26, %v731_v42  ;;  %v735_v0 = vmul.f32 %v1527_v15, %v1527_v15  ;;  %v741_v26 = vmul.f32 %v1583_v37, %v1583_v37 }
 0x10a   :  { %1266 = vst [vmem:[#allocation2 + $0xe8] sm:$0xff] %v1226_v45   ;;  %v751_v45 = vmul.f32 %v1559_v38, %v1559_v38 }
 0x10b   :  { %v795_v33 = vadd.f32 %v794_v54, %v732_v48  ;;  %v663_v58 = vadd.f32 %v662_v52, %v1513_v5 }
 0x10d   :  { %v664_v56 = vadd.f32 %v663_v58, %v1519_v9  ;;  %v796_v7 = vadd.f32 %v795_v33, %v733_v55  ;;  %v737_v9 = vmul.f32 %v1545_v27, %v1545_v27  ;;  %v743_v55 = vmul.f32 %v1491_v53, %v1491_v53 }
 0x10e   :  { %v744_v58 = vmul.f32 %v1497_v59, %v1497_v59 }
 0x10f   :  { %v665_v18 = vadd.f32 %v664_v56, %v1527_v15  ;;  %v797_v60 = vadd.f32 %v796_v7, %v734_v1  ;;  %v1649_v15 = vpop.f32.mrf.mxu2  ;;  %v1669_v54 = vpop.f32.mrf.mxu3  ;;  %v745_v56 = vmul.f32 %v1511_v3, %v1511_v3 }
 0x111   :  { %v666_v5 = vadd.f32 %v665_v18, %v1537_v21  ;;  %v798_v19 = vadd.f32 %v797_v60, %v735_v0  ;;  %v1196_v21 = vpack.c.bf16 %v1649_v15, %v1633_v57  ;;  %v746_v0 = vmul.f32 %v1515_v6, %v1515_v6 }
 0x113   :  { %v667_v22 = vadd.f32 %v666_v5, %v1545_v27  ;;  %v799_v23 = vadd.f32 %v798_v19, %v736_v4  ;;  %v739_v27 = vmul.f32 %v1563_v41, %v1563_v41  ;;  %1260 = vst [vmem:[#allocation2 + $0xb8] sm:$0xff] %v1196_v21  }
 0x115   :  { %v668_v8 = vadd.f32 %v667_v22, %v1555_v34  ;;  %v800_v32 = vadd.f32 %v799_v23, %v737_v9 }
 0x117   :  { %v669_v49 = vadd.f32 %v668_v8, %v1563_v41  ;;  %v801_v30 = vadd.f32 %v800_v32, %v738_v31  ;;  %v742_v41 = vmul.f32 %v1593_v2, %v1593_v2  ;;  %v750_v8 = vmul.f32 %v1547_v28, %v1547_v28 }
 0x119   :  { %v802_v35 = vadd.f32 %v801_v30, %v739_v27  ;;  %v670_v34 = vadd.f32 %v669_v49, %v1575_v62  ;;  %v752_v27 = vmul.f32 %v1565_v43, %v1565_v43 }
 0x11b   :  { %v803_v42 = vadd.f32 %v802_v35, %v740_v20  ;;  %v671_v51 = vadd.f32 %v670_v34, %v1583_v37  ;;  %v754_v20 = vmul.f32 %v1585_v46, %v1585_v46 }
 0x11d   :  { %v804_v48 = vadd.f32 %v803_v42, %v741_v26  ;;  %v672_v52 = vadd.f32 %v671_v51, %v1593_v2 }
 0x11f   :  { %v673_v62 = vadd.f32 %v672_v52, %v1491_v53  ;;  %v805_v33 = vadd.f32 %v804_v48, %v742_v41  ;;  %v1683_v53 = vpop.f32.mrf.mxu3 }
 0x120   :  { %v1231_v4 = vpack.c.bf16 %v1683_v53, %v1669_v54 }
 0x121   :  { %v674_v1 = vadd.f32 %v673_v62, %v1497_v59  ;;  %v806_v37 = vadd.f32 %v805_v33, %v743_v55  ;;  %v747_v59 = vmul.f32 %v1523_v12, %v1523_v12  ;;  %v757_v33 = vmul.f32 %v1633_v57, %v1633_v57 }
 0x122   :  { %1267 = vst [vmem:[#allocation2 + $0xf0] sm:$0xff] %v1231_v4  }
 0x123   :  { %v675_v7 = vadd.f32 %v674_v1, %v1511_v3  ;;  %v807_v2 = vadd.f32 %v806_v37, %v744_v58  ;;  %v748_v3 = vmul.f32 %v1529_v16, %v1529_v16  ;;  %v759_v37 = vmul.f32 %v1525_v13, %v1525_v13 }
 0x125   :  { %v676_v18 = vadd.f32 %v675_v7, %v1515_v6  ;;  %v808_v60 = vadd.f32 %v807_v2, %v745_v56  ;;  %v749_v6 = vmul.f32 %v1541_v24, %v1541_v24  ;;  %v760_v7 = vmul.f32 %v1531_v17, %v1531_v17 }
 0x127   :  { %v677_v5 = vadd.f32 %v676_v18, %v1523_v12  ;;  %v809_v19 = vadd.f32 %v808_v60, %v746_v0  ;;  %v1699_v21 = vpop.f32.mrf.mxu3 }
 0x129   :  { %v678_v9 = vadd.f32 %v677_v5, %v1529_v16  ;;  %v810_v22 = vadd.f32 %v809_v19, %v747_v59 }
 0x12b   :  { %v811_v23 = vadd.f32 %v810_v22, %v748_v3  ;;  %v679_v31 = vadd.f32 %v678_v9, %v1541_v24 }
 0x12d   :  { %v680_v32 = vadd.f32 %v679_v31, %v1547_v28  ;;  %v812_v12 = vadd.f32 %v811_v23, %v749_v6  ;;  %v753_v28 = vmul.f32 %v1579_v10, %v1579_v10 }
 0x12f   :  { %v681_v16 = vadd.f32 %v680_v32, %v1559_v38  ;;  %v813_v49 = vadd.f32 %v812_v12, %v750_v8 }
 0x131   :  { %v682_v30 = vadd.f32 %v681_v16, %v1565_v43  ;;  %v814_v24 = vadd.f32 %v813_v49, %v751_v45  ;;  %v1716_v43 = vpop.f32.mrf.mxu3 }
 0x132   :  { %v1236_v51 = vpack.c.bf16 %v1716_v43, %v1699_v21 }
 0x133   :  { %v683_v35 = vadd.f32 %v682_v30, %v1579_v10  ;;  %v815_v34 = vadd.f32 %v814_v24, %v752_v27  ;;  %v755_v10 = vmul.f32 %v1597_v61, %v1597_v61  ;;  %v770_v27 = vmul.f32 %v1651_v36, %v1651_v36 }
 0x134   :  { %1268 = vst [vmem:[#allocation2 + $0xf8] sm:$0xff] %v1236_v51   ;;  %v774_v51 = vmul.f32 %v1716_v43, %v1716_v43 }
 0x135   :  { %v684_v38 = vadd.f32 %v683_v35, %v1585_v46  ;;  %v816_v42 = vadd.f32 %v815_v34, %v753_v28  ;;  %v756_v46 = vmul.f32 %v1613_v14, %v1613_v14  ;;  %859 = dma.vmem_to_hbm [thread:$0]  %s852_s21, 4096, %s854_s24, [#allocation3], %s1329_s2, %s1329_s2, %s1330_s25   ;;  %v771_v28 = vmul.f32 %v1669_v54, %v1669_v54 }
 0x136   :  { %v772_v34 = vmul.f32 %v1683_v53, %v1683_v53 }
 0x137   :  { %v817_v26 = vadd.f32 %v816_v42, %v754_v20  ;;  %v685_v48 = vadd.f32 %v684_v38, %v1597_v61  ;;  %v758_v61 = vmul.f32 %v1649_v15, %v1649_v15  ;;  %v773_v20 = vmul.f32 %v1699_v21, %v1699_v21 }
 0x139   :  { %v818_v52 = vadd.f32 %v817_v26, %v755_v10  ;;  %v686_v41 = vadd.f32 %v685_v48, %v1613_v14 }
 0x13b   :  { %v819_v55 = vadd.f32 %v818_v52, %v756_v46  ;;  %v687_v62 = vadd.f32 %v686_v41, %v1633_v57  ;;  %v761_v57 = vmul.f32 %v1543_v25, %v1543_v25 }
 0x13d   :  { %v820_v58 = vadd.f32 %v819_v55, %v757_v33  ;;  %v688_v1 = vadd.f32 %v687_v62, %v1649_v15  ;;  %v762_v15 = vmul.f32 %v1549_v29, %v1549_v29 }
 0x13f   :  { %v689_v14 = vadd.f32 %v688_v1, %v1525_v13  ;;  %v821_v56 = vadd.f32 %v820_v58, %v758_v61  ;;  %v763_v13 = vmul.f32 %v1561_v39, %v1561_v39 }
 0x141   :  { %v690_v2 = vadd.f32 %v689_v14, %v1531_v17  ;;  %v822_v0 = vadd.f32 %v821_v56, %v759_v37  ;;  %v764_v17 = vmul.f32 %v1567_v44, %v1567_v44 }
 0x143   :  { %v691_v18 = vadd.f32 %v690_v2, %v1543_v25  ;;  %v823_v60 = vadd.f32 %v822_v0, %v760_v7  ;;  %v765_v25 = vmul.f32 %v1581_v11, %v1581_v11 }
 0x145   :  { %v692_v4 = vadd.f32 %v691_v18, %v1549_v29  ;;  %v824_v59 = vadd.f32 %v823_v60, %v761_v57  ;;  %v766_v29 = vmul.f32 %v1587_v47, %v1587_v47 }
 0x147   :  { %v693_v5 = vadd.f32 %v692_v4, %v1561_v39  ;;  %v825_v19 = vadd.f32 %v824_v59, %v762_v15  ;;  %v767_v39 = vmul.f32 %v1599_v40, %v1599_v40 }
 0x149   :  { %v694_v3 = vadd.f32 %v693_v5, %v1567_v44  ;;  %v826_v9 = vadd.f32 %v825_v19, %v763_v13  ;;  %v768_v44 = vmul.f32 %v1615_v50, %v1615_v50 }
 0x14b   :  { %v827_v22 = vadd.f32 %v826_v9, %v764_v17  ;;  %v695_v6 = vadd.f32 %v694_v3, %v1581_v11  ;;  %v769_v11 = vmul.f32 %v1635_v63, %v1635_v63 }
 0x14d   :  { %v696_v23 = vadd.f32 %v695_v6, %v1587_v47  ;;  %v828_v31 = vadd.f32 %v827_v22, %v765_v25 }
 0x14f   :  { %v697_v8 = vadd.f32 %v696_v23, %v1599_v40  ;;  %v829_v32 = vadd.f32 %v828_v31, %v766_v29 }
 0x151   :  { %v698_v12 = vadd.f32 %v697_v8, %v1615_v50  ;;  %v830_v45 = vadd.f32 %v829_v32, %v767_v39 }
 0x153   :  { %v699_v16 = vadd.f32 %v698_v12, %v1635_v63  ;;  %v831_v49 = vadd.f32 %v830_v45, %v768_v44 }
 0x155   :  { %v700_v47 = vadd.f32 %v699_v16, %v1651_v36  ;;  %v832_v30 = vadd.f32 %v831_v49, %v769_v11 }
 0x157   :  { %v833_v40 = vadd.f32 %v832_v30, %v770_v27  ;;  %v701_v24 = vadd.f32 %v700_v47, %v1669_v54 }
 0x159   :  { %v834_v50 = vadd.f32 %v833_v40, %v771_v28  ;;  %v702_v35 = vadd.f32 %v701_v24, %v1683_v53 }
 0x15b   :  { %v835_v63 = vadd.f32 %v834_v50, %v772_v34  ;;  %v703_v38 = vadd.f32 %v702_v35, %v1699_v21 }
 0x15d   :  { %v836_v36 = vadd.f32 %v835_v63, %v773_v20  ;;  %v704_v42 = vadd.f32 %v703_v38, %v1716_v43 }
 0x15f   :  { %v705_v26 = vrot.slane %v704_v42, 4  ;;  %v837_v54 = vadd.f32 %v836_v36, %v774_v51 }
 0x161   :  { %v706_v48 = vadd.f32 %v705_v26, %v704_v42  ;;  %v838_v10 = vrot.slane %v837_v54, 4 }
 0x163   :  { %v707_v52 = vrot.slane %v706_v48, 2  ;;  %v839_v41 = vadd.f32 %v838_v10, %v837_v54 }
 0x165   :  { %v708_v46 = vadd.f32 %v707_v52, %v706_v48  ;;  %v840_v53 = vrot.slane %v839_v41, 2 }
 0x167   :  { %v709_v55 = vrot.slane %v708_v46, 1  ;;  %v841_v62 = vadd.f32 %v840_v53, %v839_v41 }
 0x169   :  { %v842_v33 = vrot.slane %v841_v62, 1  ;;  %v710_v21 = vadd.f32 %v709_v55, %v708_v46 }
 0x16b   :  { %v843_v43 = vadd.f32 %v842_v33, %v841_v62 }
 0x16d   :  { %v845_v58 = vsel %vm844_vm1, %v710_v21, %v843_v43 }
 0x16e   :  { %846 = vst [vmem:[#allocation4] sm:$0x3] %v845_v58 }
 0x16f   :  { %870 = dma.vmem_to_hbm [thread:$0]  %s866_s27, 32, %s868_s30, [#allocation5]  }
 0x170   :  { %1324 = dma.done.wait [#allocation3], 4096  }
 0x171   :  { %1325 = vsyncadd [#allocation3], 4294963200 }
 0x172   :  { %1326 = dma.done.wait [#allocation5], 32  }
 0x173   :  { %1327 = vsyncadd [#allocation5], 4294967264 }
 0x174   :  { %879 = vsyncpa [#allocation3], 1 }
 0x175   :  { %880 = vsyncpa [#allocation5], 1 }

</bundles_post_ra>
